<compile_context>
chip_gen: v7x
topology: tpu7x:2x2x1
jax: 0.10.0
libtpu: 0.0.40
codegen_flags: <defaults>
</compile_context>

<pallas_src>
import jax
import jax.numpy as jnp
from jax.experimental import pallas as pl
from jax.experimental.pallas import tpu as pltpu


def _round_up(x, m):
    return (x + m - 1) // m * m


def _cdiv(a, b):
    return (a + b - 1) // b


def _vmem_capacity_bytes():
    try:
        cap = int(pltpu.get_tpu_info().vmem_capacity_bytes)
        if cap > 0:
            return cap
    except Exception:
        pass
    return 64 * 1024 * 1024  # conservative default (v7x per-TC VMEM)


# ---------------------------------------------------------------------------
# Kernels (native layout: channels on sublanes, flattened T*V on lanes)
# ---------------------------------------------------------------------------

def _conv1x1_kernel(x_ref, w_ref, b_ref, o_ref):
    # x_ref: (bt, c_in, tn)   spatial tile, channels on sublanes
    # w_ref: (c_out, c_in)    full weight, resident in VMEM across the grid
    # b_ref: (c_out, 1)       bias, broadcast along lanes
    # o_ref: (bt, c_out, tn)  lane-dense output tile
    w = w_ref[...]
    b = b_ref[...]
    bt = x_ref.shape[0]
    for i in range(bt):  # static, short unrolled loop over packed batch rows
        acc = jnp.dot(w, x_ref[i], preferred_element_type=jnp.float32)
        o_ref[i] = (acc + b).astype(o_ref.dtype)


def _pad_channels_kernel(x_ref, o_ref):
    # x_ref: (bt, c_in, tn), o_ref: (bt, c_out, tn).
    # Disjoint stores: zero only the new channels, copy the original ones.
    bt, c_out, tn = o_ref.shape
    c_in = x_ref.shape[1]
    o_ref[:, c_in:, :] = jnp.zeros((bt, c_out - c_in, tn), dtype=o_ref.dtype)
    o_ref[:, :c_in, :] = x_ref[...].astype(o_ref.dtype)


# ---------------------------------------------------------------------------
# Tiling selection
# ---------------------------------------------------------------------------

def _choose_tiling(B, N, c_in, c_out, itemsize, budget, tn_max):
    n128 = _round_up(N, 128)
    # Double-buffered input + output tile bytes per spatial lane.
    per_lane = (c_in + c_out) * itemsize * 2
    tn_cap = max(128, min(tn_max, (budget // per_lane) // 128 * 128))

    num_tiles = _cdiv(n128, tn_cap)
    # v7x has 2 TensorCores: give the grid at least 2 steps when the data allows it.
    if B * num_tiles < 2 and n128 >= 256:
        num_tiles = 2
    # Balanced, 128-aligned spatial tile; the last partial block is handled in-kernel.
    tn = _round_up(_cdiv(N, num_tiles), 128)
    num_tiles = _cdiv(N, tn)

    # Small-graph path: pack batch rows per step to amortize per-step overhead.
    bt = 1
    if num_tiles == 1 and B > 1:
        step_bytes = max(1, (c_in + c_out) * tn * itemsize)
        target = 2 * 1024 * 1024
        bt_cap = min(B, max(1, target // step_bytes), max(1, budget // (2 * step_bytes)))
        for cand in range(bt_cap, 0, -1):
            # keep >=2 grid steps when possible (v7x megacore balance)
            if B % cand == 0 and (B // cand) * num_tiles >= min(2, B):
                bt = cand
                break
    return bt, tn, num_tiles


# ---------------------------------------------------------------------------
# Pallas wrappers on the (B, C, N) view   (N = T*V, handled ragged in-kernel)
# ---------------------------------------------------------------------------

def _conv1x1_nc(x3, w, b, *, bt, tn, vmem_limit):
    B, c_in, N = x3.shape
    c_out = w.shape[0]
    b2 = b.reshape(c_out, 1)
    grid = (B // bt, _cdiv(N, tn))
    flops = 2 * B * N * c_in * c_out
    bytes_accessed = (x3.dtype.itemsize * B * N * (c_in + c_out)
                      + w.dtype.itemsize * (c_in * c_out + c_out))
    return pl.pallas_call(
        _conv1x1_kernel,
        out_shape=jax.ShapeDtypeStruct((B, c_out, N), x3.dtype),
        grid=grid,
        in_specs=[
            pl.BlockSpec((bt, c_in, tn), lambda bi, ni: (bi, 0, ni)),
            pl.BlockSpec((c_out, c_in), lambda bi, ni: (0, 0)),
            pl.BlockSpec((c_out, 1), lambda bi, ni: (0, 0)),
        ],
        out_specs=pl.BlockSpec((bt, c_out, tn), lambda bi, ni: (bi, 0, ni)),
        compiler_params=pltpu.CompilerParams(
            dimension_semantics=("parallel", "parallel"),
            vmem_limit_bytes=vmem_limit),
        cost_estimate=pl.CostEstimate(
            flops=flops, transcendentals=0, bytes_accessed=bytes_accessed),
    )(x3, w, b2)


def _pad_channels_nc(x3, c_out, *, bt, tn, vmem_limit):
    B, c_in, N = x3.shape
    grid = (B // bt, _cdiv(N, tn))
    bytes_accessed = x3.dtype.itemsize * B * N * (c_in + c_out)
    return pl.pallas_call(
        _pad_channels_kernel,
        out_shape=jax.ShapeDtypeStruct((B, c_out, N), x3.dtype),
        grid=grid,
        in_specs=[pl.BlockSpec((bt, c_in, tn), lambda bi, ni: (bi, 0, ni))],
        out_specs=pl.BlockSpec((bt, c_out, tn), lambda bi, ni: (bi, 0, ni)),
        compiler_params=pltpu.CompilerParams(
            dimension_semantics=("parallel", "parallel"),
            vmem_limit_bytes=vmem_limit),
        cost_estimate=pl.CostEstimate(
            flops=0, transcendentals=0, bytes_accessed=bytes_accessed),
    )(x3)


# ---------------------------------------------------------------------------
# Align forward (NCHW in / NCHW out, matching the PyTorch module)
# ---------------------------------------------------------------------------

def align_forward(x, w, b, c_in, c_out, *, tn_max=8192):
    """x: (B, c_in, T, V).  w: (c_out, c_in) or None.  b: (c_out,) or None."""
    B, C, T, V = x.shape
    assert C == c_in

    if c_in == c_out:
        return x

    N = T * V
    x3 = x.reshape(B, c_in, N)  # free reshape (T, V are trailing contiguous dims)

    itemsize = jnp.dtype(x.dtype).itemsize
    cap = _vmem_capacity_bytes()
    budget = max(4 * 1024 * 1024, int(cap * 0.35))       # tile working-set budget
    vmem_limit = min(int(cap * 0.75), 100 * 1024 * 1024)  # fits v7x 64 MiB / v5e-v6e 128 MiB

    bt, tn, _ = _choose_tiling(B, N, c_in, c_out, itemsize, budget, tn_max)

    if c_in > c_out:
        assert w is not None and b is not None
        # Note: weights are cast to the activation dtype; accumulation stays fp32.
        y3 = _conv1x1_nc(x3, w.astype(x.dtype), b.astype(x.dtype),
                         bt=bt, tn=tn, vmem_limit=vmem_limit)
    else:
        y3 = _pad_channels_nc(x3, c_out, bt=bt, tn=tn, vmem_limit=vmem_limit)

    return y3.reshape(B, c_out, T, V)


# ---------------------------------------------------------------------------
# Main
# ---------------------------------------------------------------------------

if __name__ == "__main__":
    key = jax.random.PRNGKey(0)
    k_x, k_w, k_b, k_x2, k_x3 = jax.random.split(key, 5)

    B, c_in, T, V = 2, 8, 16, 16
    x = jax.random.normal(k_x, (B, c_in, T, V), dtype=jnp.float32)

    # --- Case 1: c_in > c_out  (1x1 conv path) ------------------------------
    c_out = 4
    bound = 1.0 / (c_in ** 0.5)   # Conv2d-style uniform init
    w = jax.random.uniform(k_w, (c_out, c_in), minval=-bound, maxval=bound,
                           dtype=jnp.float32)   # Conv2d weight (c_out, c_in, 1, 1) squeezed
    b = jax.random.uniform(k_b, (c_out,), minval=-bound, maxval=bound,
                           dtype=jnp.float32)

    y_conv = jax.block_until_ready(align_forward(x, w, b, c_in, c_out))
    ref_conv = jnp.einsum("bctv,oc->botv", x, w) + b[None, :, None, None]
    assert y_conv.shape == (B, c_out, T, V)
    assert jnp.allclose(y_conv, ref_conv, atol=1e-5, rtol=1e-5)

    # --- Case 1b: ragged spatial size (V=25 -> T*V=300, not a multiple of 128)
    T2, V2 = 12, 25
    x_r = jax.random.normal(k_x2, (B, c_in, T2, V2), dtype=jnp.float32)
    y_conv_r = jax.block_until_ready(align_forward(x_r, w, b, c_in, c_out))
    ref_conv_r = jnp.einsum("bctv,oc->botv", x_r, w) + b[None, :, None, None]
    assert y_conv_r.shape == (B, c_out, T2, V2)
    assert jnp.allclose(y_conv_r, ref_conv_r, atol=1e-5, rtol=1e-5)

    # --- Case 1c: B=1 (forced 2-way spatial split for megacore balance) -----
    x_b1 = x[:1]
    y_b1 = jax.block_until_ready(align_forward(x_b1, w, b, c_in, c_out))
    ref_b1 = jnp.einsum("bctv,oc->botv", x_b1, w) + b[None, :, None, None]
    assert jnp.allclose(y_b1, ref_b1, atol=1e-5, rtol=1e-5)

    # --- Case 1d: many small batches (batch-packed grid steps, ragged N=100) -
    B2, T3, V3 = 8, 4, 25
    x_m = jax.random.normal(k_x3, (B2, c_in, T3, V3), dtype=jnp.float32)
    y_m = jax.block_until_ready(align_forward(x_m, w, b, c_in, c_out))
    ref_m = jnp.einsum("bctv,oc->botv", x_m, w) + b[None, :, None, None]
    assert y_m.shape == (B2, c_out, T3, V3)
    assert jnp.allclose(y_m, ref_m, atol=1e-5, rtol=1e-5)

    # --- Case 2: c_in < c_out  (zero-pad path) -------------------------------
    c_out_big = 12
    y_pad = jax.block_until_ready(align_forward(x, None, None, c_in, c_out_big))
    ref_pad = jnp.concatenate(
        [x, jnp.zeros((B, c_out_big - c_in, T, V), dtype=x.dtype)], axis=1)
    assert y_pad.shape == (B, c_out_big, T, V)
    assert jnp.allclose(y_pad, ref_pad)

    # --- Case 3: c_in == c_out (identity) ------------------------------------
    y_id = jax.block_until_ready(align_forward(x, None, None, c_in, c_in))
    assert jnp.allclose(y_id, x)

    print("KERNEL_OK")
</pallas_src>

<mosaic_0001>
module attributes {stable_mosaic.version = 11 : i64} {
  func.func @_conv1x1_kernel(%arg0: i32, %arg1: i32, %arg2: memref<1x8x256xf32, #tpu.memory_space<vmem>>, %arg3: memref<4x8xf32, #tpu.memory_space<vmem>>, %arg4: memref<4x1xf32, #tpu.memory_space<vmem>>, %arg5: memref<1x4x256xf32, #tpu.memory_space<vmem>>) attributes {dimension_semantics = [#tpu.dimension_semantics<parallel>, #tpu.dimension_semantics<parallel>], iteration_bounds = array<i64: 2, 1>, scalar_prefetch = 0 : i64, scratch_operands = 0 : i64, tpu.core_type = #tpu.core_type<tc>, window_params = [{transform_indices = @transform_0, window_bounds = array<i64: 1, 8, 256>}, {pipeline_mode = #tpu.pipeline_mode<synchronous>, transform_indices = @transform_1, window_bounds = array<i64: 4, 8>}, {pipeline_mode = #tpu.pipeline_mode<synchronous>, transform_indices = @transform_2, window_bounds = array<i64: 4, 1>}, {transform_indices = @transform_3, window_bounds = array<i64: 1, 4, 256>}]} {
    %c0 = arith.constant 0 : index
    %c0_0 = arith.constant 0 : index
    %0 = vector.load %arg3[%c0, %c0_0] : memref<4x8xf32, #tpu.memory_space<vmem>>, vector<4x8xf32>
    %c0_1 = arith.constant 0 : index
    %c0_2 = arith.constant 0 : index
    %1 = vector.load %arg4[%c0_1, %c0_2] : memref<4x1xf32, #tpu.memory_space<vmem>>, vector<4x1xf32>
    %c0_3 = arith.constant 0 : index
    %c0_4 = arith.constant 0 : index
    %c0_5 = arith.constant 0 : index
    %2 = vector.load %arg2[%c0_3, %c0_4, %c0_5] : memref<1x8x256xf32, #tpu.memory_space<vmem>>, vector<1x8x256xf32>
    %3 = vector.shape_cast %2 : vector<1x8x256xf32> to vector<8x256xf32>
    %cst = arith.constant dense<0.000000e+00> : vector<4x256xf32>
    %4 = tpu.matmul %0, %3, %cst {dimension_numbers = #tpu.dot_dimension_numbers<[1], [0], [0], [1], [0, 0, 1, 1], [], []>} : vector<4x8xf32>, vector<8x256xf32>, vector<4x256xf32> -> vector<4x256xf32>
    %5 = vector.broadcast %1 : vector<4x1xf32> to vector<4x256xf32>
    %6 = arith.addf %4, %5 : vector<4x256xf32>
    %c0_6 = arith.constant 0 : index
    %c0_7 = arith.constant 0 : index
    %c0_8 = arith.constant 0 : index
    %7 = vector.load %arg5[%c0_6, %c0_7, %c0_8] : memref<1x4x256xf32, #tpu.memory_space<vmem>>, vector<1x4x256xf32>
    %8 = vector.shape_cast %7 : vector<1x4x256xf32> to vector<4x256xf32>
    %9 = vector.shape_cast %6 : vector<4x256xf32> to vector<1x4x256xf32>
    tpu.vector_store %arg5[%c0_6, %c0_7, %c0_8], %9 {strides = array<i32>} : memref<1x4x256xf32, #tpu.memory_space<vmem>>, vector<1x4x256xf32>,
    return
  }
  func.func @transform_0(%arg0: i32, %arg1: i32) -> (i32, i32, i32) {
    %c0_i32 = arith.constant 0 : i32
    %c0_i32_0 = arith.constant 0 : i32
    return %arg0, %c0_i32, %arg1 : i32, i32, i32
  }
  func.func @transform_1(%arg0: i32, %arg1: i32) -> (i32, i32) {
    %c0_i32 = arith.constant 0 : i32
    %c0_i32_0 = arith.constant 0 : i32
    %c0_i32_1 = arith.constant 0 : i32
    return %c0_i32, %c0_i32_0 : i32, i32
  }
  func.func @transform_2(%arg0: i32, %arg1: i32) -> (i32, i32) {
    %c0_i32 = arith.constant 0 : i32
    %c0_i32_0 = arith.constant 0 : i32
    %c0_i32_1 = arith.constant 0 : i32
    return %c0_i32, %c0_i32_0 : i32, i32
  }
  func.func @transform_3(%arg0: i32, %arg1: i32) -> (i32, i32, i32) {
    %c0_i32 = arith.constant 0 : i32
    %c0_i32_0 = arith.constant 0 : i32
    return %arg0, %c0_i32, %arg1 : i32, i32, i32
  }
}

</mosaic_0001>

<bundles_post_ra>
// kernel: tpu_custom_call.1
= control target key start
LH: loop header
LB: loop body
LE: loop exit
PB: predicated region body
PF: predicated region fallthrough
CT: control target
= control target key end

     0   :  { %8 = vsyncpa [#allocation3], 0  ;;  %s797_s0 = inlined_call_operand.hbm [shape: f32[2,8,256], index: 0, kind: input, shape index: {}]   ;;  %s798_s1 = inlined_call_operand.vmem [shape: f32[4,8], index: 1, kind: input, shape index: {}]   ;;  %s799_s2 = inlined_call_operand.vmem [shape: f32[4,1], index: 2, kind: input, shape index: {}]   ;;  %s800_s3 = inlined_call_operand.hbm [shape: f32[2,4,256], index: 3, kind: output, shape index: {}]  }
   0x1   :  { %10 = vsyncpa [#allocation3 + $0x1], 0 }
   0x2   :  { %11 = vsyncpa [#allocation4], 0 }
   0x3   :  { %13 = vsyncpa [#allocation4 + $0x1], 0  ;;  %s618_s12 = smov 0   ;;  %s620_s13 = smov 0  }
   0x4   :  { %s622_s14 = smov 0   ;;  %s624_s15 = smov 0  }
   0x5   :  { %s626_s16 = smov 0   ;;  %s628_s17 = smov 0  }
   0x6 LB: > { %s397_s18 = sadd.s32 4294967295, %s592_s17   ;;  %s398_s19 = sadd.s32 4294967294, %s592_s17   ;;  %s592_s17 = sphi %s628_s17, %s19_s17   ;;  %s588_s16 = sphi %s626_s16, %s816_s16   ;;  %s584_s15 = sphi %s624_s15, %s815_s15   ;;  %s580_s14 = sphi %s622_s14, %s814_s14   ;;  %s576_s13 = sphi %s620_s13, %s813_s13   ;;  %s572_s12 = sphi %s618_s12, %s812_s12  }
   0x7   : > { %s31_s20 = sadd.s32 1, %s588_s16  ;;  %s40_s21 = sadd.s32 1, %s580_s14 }
   0x8   : > { %p33_p0 = scmp.ge.s32.totalorder %s31_s20, 2  ;;  %p47_p1 = scmp.ne.s32.totalorder %s580_s14, %s576_s13 }
   0x9   : > { %p48_p2 = scmp.eq.s32.totalorder %s592_s17, 0  ;;  %p53_p3 = scmp.ne.s32.totalorder %s576_s13, %s572_s12 }
   0xa   : > { %s818_s20 = smov (%p33_p0, %s31_s20), 0  ;;  %p54_p5 = scmp.eq.s32.totalorder %s397_s18, 0 }
   0xb   : > { %p659_p4 = por %p48_p2, %p47_p1  ;;  %s35_s23 = ssub.s32 %s588_s16, %s818_s20 }
   0xc   : > { %p121_p6 = scmp.eq.s32.totalorder %s397_s18, 1  ;;  %p38_p7 = scmp.eq.s32.totalorder %s35_s23, 0 }
   0xd   : > { %p665_p8 = por %p54_p5, %p53_p3  ;;  %p127_p10 = scmp.eq.s32.totalorder %s398_s19, 1 }
   0xe   : > { %p669_p9 = por %p121_p6, %p47_p1  ;;  %p427_p13 = scmp.lt.s32.totalorder %s592_s17, 2 }
   0xf   : > { %s674_s26 = scalar_select %p38_p7, %s580_s14, %s40_s21  }
  0x10   : > { %s804_s25 = scalar_select %p669_p9, 1, 0 }
  0x11   : > { %p676_p11 = por %p127_p10, %p53_p3  ;;  %s153_s28 = sand.u32 1, %s580_s14  }
  0x12   : > { %s401_s29 = sshll.u32 %s153_s28, 4  ;;  %s413_s30 = sshll.u32 %s588_s16, 8 }
  0x13   : > { %s805_s27 = scalar_select %p676_p11, 1, 0 }
  0x14   : > { %s687_s6 = scalar_lea.hbm %s797_s0, %s413_s30  ;;  %s157_s7 = scalar_lea.vmem [#allocation2], %s401_s29 }
  0x15   : > { %s167_s8 = sshll.u32 %s157_s7, 4  ;;  %p693_p0 = pnand %p427_p13, %p659_p4  ;;  %s689_s8 = int_to_ptr.vmem [resolvable:$true] %s167_s8 }
  0x16   : > { %s154_s10 = scalar_lea.sflag [#allocation3], %s153_s28  ;;  %s480_s11 = scalar_lea.hbm %s687_s6, 256 }
  0x17   : > { %p481_p3 = scmp.ne.s32.totalorder %s687_s6, %s480_s11  ;;  %p482_p5 = pneg %p693_p0 }
  0x18   : > { %s485_s21 = scalar_lea.hbm %s797_s0, 512  ;;  %p486_p4 = scmp.lt.u32.totalorder %s687_s6, %s797_s0 }
  0x19   : > { %p483_p6 = pnand %p482_p5, %p481_p3  ;;  %p487_p10 = scmp.lt.u32.totalorder %s485_s21, %s480_s11 }
  0x1a   : > { %p489_p12 = scmp.lt.u32.totalorder %s480_s11, %s687_s6 }
  0x1b   : > { %p484_p7 = pneg %p483_p6  ;;  %p488_p13 = por %p487_p10, %p486_p4 }
  0x1d   : > { %p490_p1 = por %p489_p12, %p488_p13 }
  0x1f   : > { %p491_p2 = pnand %p490_p1, %p484_p7 }
  0x21   : > { %494 = shalt.err (!%p491_p2)
}
  0x22   : > { %s495_s28 = scalar_lea.vmem %s689_s8, 256  ;;  %s594_s29 = smov [#allocation2]  }
  0x23   : > { %p496_p3 = scmp.ne.s32.totalorder %s689_s8, %s495_s28  ;;  %s500_s30 = sshll.u32 %s594_s29, 4  ;;  %s501_s30 = int_to_ptr.vmem [resolvable:$false] %s500_s30 }
  0x24   : > { %s502_s4 = scalar_lea.vmem %s501_s30, 512  ;;  %p503_p9 = scmp.lt.s32.totalorder %s689_s8, %s501_s30 }
  0x25   : > { %p498_p6 = pnand %p496_p3, %p482_p5  ;;  %p504_p4 = scmp.lt.s32.totalorder %s502_s4, %s495_s28 }
  0x27   : > { %p499_p11 = pneg %p498_p6  ;;  %p505_p10 = por %p504_p4, %p503_p9 }
  0x29   : > { %p506_p12 = pnand %p505_p10, %p499_p11 }
  0x2b   : > { %509 = shalt.err (!%p506_p12)
}
  0x2c   : > { %422 = dma.hbm_to_vmem [thread:$0]  (!%p693_p0), %s687_s6, 256, %s689_s8, %s154_s10  }
  0x2d   : > { %p807_p1 = scmp.lt.s32.totalorder %s592_s17, 3  ;;  %p808_p2 = scmp.ge.s32.totalorder %s592_s17, 1 }
  0x2f   : > { %p173_p5 = pnand %p808_p2, %p807_p1 }
  0x30   : > { %s729_s5 = sand.u32 (!%p173_p5), 1, %s576_s13  }
  0x31   : > { %176 = sbr.rel (%p173_p5) target bundleno = 292 (0x124), region = 32  ;;  %s405_s7 = sshll.u32 (!%p173_p5), %s729_s5, 4 }
  0x32   : > { %s179_s11 = scalar_lea.sflag (!%p173_p5), [#allocation3], %s729_s5  ;;  %s182_s18 = scalar_lea.vmem (!%p173_p5), [#allocation2], %s405_s7 }
  0x38   : > { %563 = dma.done.wait (%p665_p8), %s179_s11, 256  }
  0x39   : > { %565 = vsyncadd (%p665_p8), %s179_s11, 4294967040  ;;  %v595_v0 = vmov 0.0   ;;  %v596_v1 = vmov 0   ;;  %v210_v2 = vld [vmem:[%s182_s18 + $0x8] sm:$0xff]  ;;  %v209_v3 = vld [vmem:[%s182_s18] sm:$0xff]  ;;  %vm216_vm0 = vcmask 64512  }
  0x3a   : > { %284 = vmatprep.mubr.f32.mxu0 %v595_v0  ;;  %479 = vset.pattern.permute.xlu0 %v596_v1  ;;  %v207_v4 = vld [vmem:[%s798_s1] sm:$0xf]  ;;  %s406_s24 = sshll.u32 %s729_s5, 3  ;;  %s414_s19 = sshll.u32 %s584_s15, 7 }
  0x3b   : > { %220 = vmatprep.subr.mxu0 %v210_v2  ;;  %v208_v5 = vld [vmem:[%s799_s2] sm:$0xf]  ;;  %s204_s21 = scalar_lea.vmem [#allocation5], %s406_s24  ;;  %s748_s29 = scalar_lea.hbm %s800_s3, %s414_s19 }
  0x3c   : > { %221 = vmatpush1.msra.mxu0 %v209_v3  ;;  %213 = vperm.xlu0 %479, %v208_v5   ;;  %s313_s22 = sshll.u32 %s204_s21, 4  ;;  %s297_s30 = scalar_lea.sflag [#allocation4], %s729_s5  ;;  %s750_s22 = int_to_ptr.vmem [resolvable:$true] %s313_s22 }
  0x3d   : > { %407 = vmatmul.mubr.msk.f32.vlgmr.msra.gmra.mrb[0].mxu0 %vm216_vm0, %v207_v4  ;;  %s510_s4 = scalar_lea.vmem %s750_s22, 128  ;;  %p809_p9 = scmp.ne.s32.totalorder %s804_s25, 0 }
  0x3e   : > { %p511_p8 = scmp.ne.s32.totalorder %s750_s22, %s510_s4  ;;  %s597_s15 = smov [#allocation5]  }
  0x3f   : > { %s514_s7 = sshll.u32 %s597_s15, 4  ;;  %s515_s7 = int_to_ptr.vmem [resolvable:$false] %s514_s7 }
  0x40   : > { %p512_p11 = pnand %p511_p8, %p809_p9  ;;  %s516_s11 = scalar_lea.vmem %s515_s7, 256 }
  0x41   : > { %p517_p7 = scmp.lt.s32.totalorder %s750_s22, %s515_s7  ;;  %p518_p13 = scmp.lt.s32.totalorder %s516_s11, %s510_s4 }
  0x42   : > { %p513_p0 = pneg %p512_p11 }
  0x43   : > { %p519_p3 = por %p518_p13, %p517_p7 }
  0x45   : > { %p520_p6 = pnand %p519_p3, %p513_p0 }
  0xbb   : > { %v214_v6 = vpop.permute.xlu0 %213 }
 0x110   : > { %v286_v7 = vpop.f32.mrb[0].mxu0 }
 0x111   : > { %v287_v8 = vadd.f32 %v286_v7, %v214_v6  ;;  %v288_v9 = vpop.f32.mrb[1].mxu0 }
 0x112   : > { %v289_v10 = vadd.f32 %v288_v9, %v214_v6 }
 0x114   : > { %v293_v11 = vcombine.low %v287_v8, %v289_v10 }
 0x116   : > { %295 = vst [vmem:[%s204_s21] sm:$0xff] %v293_v11 }
 0x117   : > { %523 = shalt.err (!%p520_p6)
}
 0x118   : > { %s524_s5 = scalar_lea.hbm %s748_s29, 128  ;;  %s528_s8 = scalar_lea.hbm %s800_s3, 256 }
 0x119   : > { %p525_p4 = scmp.ne.s32.totalorder %s748_s29, %s524_s5  ;;  %p529_p1 = scmp.lt.u32.totalorder %s748_s29, %s800_s3 }
 0x11a   : > { %p530_p2 = scmp.lt.u32.totalorder %s528_s8, %s524_s5  ;;  %p532_p8 = scmp.lt.u32.totalorder %s524_s5, %s748_s29 }
 0x11b   : > { %p526_p10 = pnand %p525_p4, %p809_p9 }
 0x11c   : > { %p531_p5 = por %p530_p2, %p529_p1 }
 0x11d   : > { %p527_p12 = pneg %p526_p10 }
 0x11e   : > { %p533_p11 = por %p532_p8, %p531_p5 }
 0x120   : > { %p534_p0 = pnand %p533_p11, %p527_p12 }
 0x122   : > { %537 = shalt.err (!%p534_p0)
}
 0x123   : > { %417 = dma.vmem_to_hbm [thread:$0]  (%p809_p9), %s750_s22, 128, %s748_s29, %s297_s30  }
 0x124 PF: > { %s325_s24 = sand.u32 1, %s572_s12   ;;  %p810_p7 = scmp.ne.s32.totalorder %s805_s27, 0 }
 0x125   : > { %p811_p13 = scmp.ge.s32.totalorder %s592_s17, 2  ;;  %s326_s19 = scalar_lea.sflag [#allocation4], %s325_s24 }
 0x127   : > { %p424_p3 = pnand %p811_p13, %p810_p7 }
 0x129   : > { %567 = dma.done.wait (!%p424_p3), %s326_s19, 128  }
 0x12a   : > { %569 = vsyncadd (!%p424_p3), %s326_s19, 4294967168  ;;  %s19_s17 = sadd.s32 1, %s592_s17   ;;  %s812_s12 = smov %s576_s13 }
 0x12b   : > { %p16_p6 = scmp.ge.s32.totalorder %s19_s17, 4   ;;  %s813_s13 = smov %s580_s14 }
 0x12c   : > { %s814_s14 = smov %s674_s26  ;;  %s815_s15 = smov %s588_s16 }
 0x12d   : > { %s816_s16 = smov %s818_s20  ;;  %18 = sbr.rel (!%p16_p6) target bundleno = 6 (0x6), region = 77 }
 0x134   :  { %331 = vsyncpa [#allocation3], 1 }
 0x135   :  { %333 = vsyncpa [#allocation3 + $0x1], 1 }
 0x136   :  { %334 = vsyncpa [#allocation4], 1 }
 0x137   :  { %336 = vsyncpa [#allocation4 + $0x1], 1 }

</bundles_post_ra>
